<compile_context>
chip_gen: v7x
topology: tpu7x:2x2x1
jax: 0.10.0
libtpu: 0.0.40
codegen_flags: <defaults>
</compile_context>

<pallas_src>
from functools import partial

import jax
import jax.numpy as jnp
from jax.experimental import pallas as pl
from jax.experimental.pallas import tpu as pltpu


# --------------------------------------------------------------------------- #
# Kernel
# --------------------------------------------------------------------------- #
def _edge_hold_kernel(yt_ref, yp_ref, ht_ref, hp_ref, out_ref, xpa_ref, xpb_ref):
    """One (batch, row-tile) grid step: Laplacian edge maps + loss for a (TH, W) tile."""
    th = yt_ref.shape[1]
    w = yt_ref.shape[2]

    def edge(x_ref, halo_ref, pad_ref):
        x = x_ref[0]            # (TH, W) f32 tile
        halo = halo_ref[0, 0]   # (2, W): row just above / just below the tile (zeros at image edge)

        # Build the zero-padded (TH+2, W+2) tile in VMEM scratch.
        pad_ref[...] = jnp.zeros((th + 2, w + 2), jnp.float32)
        pad_ref[pl.ds(1, th), pl.ds(1, w)] = x
        pad_ref[pl.ds(0, 1), pl.ds(1, w)] = halo[0:1, :]
        pad_ref[pl.ds(th + 1, 1), pl.ds(1, w)] = halo[1:2, :]
        xp = pad_ref[...]                                        # (TH+2, W+2)

        # Separable box filter (all VPU shifted adds, no MXU):
        rs = xp[:, 0:w] + xp[:, 1:w + 1] + xp[:, 2:w + 2]        # horizontal 3-sum, (TH+2, W)
        box = rs[0:th, :] + rs[1:th + 1, :] + rs[2:th + 2, :]    # vertical 3-sum,   (TH, W)
        lap = 9.0 * x - box                                      # == 8*x - sum(8 neighbors)
        return jnp.tanh(jnp.abs(lap))                            # |tanh(lap)| == tanh(|lap|)

    e_true = edge(yt_ref, ht_ref, xpa_ref)
    e_pred = edge(yp_ref, hp_ref, xpb_ref)

    # (1 - eT)*eP + log(1 + exp(-eP))  ==  log(1 + exp(eP)) - eT*eP
    loss = jnp.log(1.0 + jnp.exp(e_pred)) - e_true * e_pred

    # Lane-dense per-tile partial sum; the final mean happens in the JAX wrapper.
    out_ref[0, 0] = jnp.sum(loss, axis=0, keepdims=True)         # (1, W)


# --------------------------------------------------------------------------- #
# Host-side helpers
# --------------------------------------------------------------------------- #
def _pick_tile_h(h, w, vmem_budget_per_input=2 * 1024 * 1024):
    """Largest multiple-of-8 divisor of H whose (TH, W) f32 tile fits a ~2 MiB budget."""
    if h % 8 != 0:
        return h  # single full-height tile (block == full dim is always legal)
    max_rows = max(8, vmem_budget_per_input // max(1, 4 * w))
    best = 8
    for cand in range(8, h + 1, 8):
        if h % cand == 0 and cand <= max_rows:
            best = cand
    return best


def _build_halos(x, tile_h):
    """x: (N, H, W) -> (N, H//tile_h, 2, W): rows just above/below each tile (zeros at edges)."""
    n, h, w = x.shape
    nt = h // tile_h
    x4 = x.reshape(n, nt, tile_h, w)
    zrow = jnp.zeros((n, 1, w), x.dtype)
    top = jnp.concatenate([zrow, x4[:, :-1, tile_h - 1, :]], axis=1)   # global row t*TH - 1
    bot = jnp.concatenate([x4[:, 1:, 0, :], zrow], axis=1)             # global row (t+1)*TH
    return jnp.stack([top, bot], axis=2)


@partial(jax.jit, static_argnames=("tile_h",))
def edge_hold_loss(y_pred, y_true, tile_h=None):
    """JAX/Pallas equivalent of EdgeHoldLoss.forward(y_pred, y_true)."""
    assert y_pred.shape == y_true.shape
    if y_pred.ndim == 4:                       # NCHW, C == 1 as in the PyTorch module
        n, c, h, w = y_pred.shape
        assert c == 1, "EdgeHoldLoss expects a single channel"
        yp = y_pred.reshape(n, h, w)
        yt = y_true.reshape(n, h, w)
    else:                                      # already (N, H, W)
        yp, yt = y_pred, y_true
        n, h, w = yp.shape

    yp = yp.astype(jnp.float32)
    yt = yt.astype(jnp.float32)

    th = tile_h if tile_h is not None else _pick_tile_h(h, w)
    assert h % th == 0, "tile_h must divide H"
    nt = h // th

    halo_t = _build_halos(yt, th)
    halo_p = _build_halos(yp, th)

    n_elems = n * h * w
    cost = pl.CostEstimate(
        flops=int(20 * n_elems),               # shifted adds + loss algebra (VPU)
        transcendentals=int(4 * n_elems),      # 2 tanh + 1 exp + 1 log per element (EUP-bound)
        bytes_accessed=int(2 * 4 * n_elems + 2 * 4 * n * nt * 2 * w + 4 * n * nt * w),
    )

    partials = pl.pallas_call(
        _edge_hold_kernel,
        out_shape=jax.ShapeDtypeStruct((n, nt, 1, w), jnp.float32),
        grid=(n, nt),
        in_specs=[
            pl.BlockSpec((1, th, w), lambda i, j: (i, j, 0)),        # y_true tile
            pl.BlockSpec((1, th, w), lambda i, j: (i, j, 0)),        # y_pred tile
            pl.BlockSpec((1, 1, 2, w), lambda i, j: (i, j, 0, 0)),   # y_true halo rows
            pl.BlockSpec((1, 1, 2, w), lambda i, j: (i, j, 0, 0)),   # y_pred halo rows
        ],
        out_specs=pl.BlockSpec((1, 1, 1, w), lambda i, j: (i, j, 0, 0)),
        scratch_shapes=[
            pltpu.VMEM((th + 2, w + 2), jnp.float32),                # padded tile, y_true
            pltpu.VMEM((th + 2, w + 2), jnp.float32),                # padded tile, y_pred
        ],
        compiler_params=pltpu.CompilerParams(
            dimension_semantics=("parallel", "parallel"),            # no carried state -> TC sharding on v7x
            vmem_limit_bytes=28 * 1024 * 1024,                       # explicit budget, safe on v7x 64 MiB VMEM
        ),
        cost_estimate=cost,
    )(yt, yp, halo_t, halo_p)

    return jnp.sum(partials) / jnp.float32(n_elems)


# --------------------------------------------------------------------------- #
# Pure-JAX (non-Pallas) reference for correctness checking
# --------------------------------------------------------------------------- #
def _reference_loss(y_pred, y_true):
    lap = jnp.array([[-1., -1., -1.], [-1., 8., -1.], [-1., -1., -1.]], jnp.float32)

    def edge(x):                               # x: (N, 1, H, W)
        xp = jnp.pad(x, ((0, 0), (0, 0), (1, 1), (1, 1)))
        h, w = x.shape[2], x.shape[3]
        out = jnp.zeros_like(x)
        for di in range(3):
            for dj in range(3):
                out = out + lap[di, dj] * xp[:, :, di:di + h, dj:dj + w]
        return jnp.abs(jnp.tanh(out))

    e_t = edge(y_true.astype(jnp.float32))
    e_p = edge(y_pred.astype(jnp.float32))
    return jnp.mean((1.0 - e_t) * e_p + jnp.log(1.0 + jnp.exp(-e_p)))


# --------------------------------------------------------------------------- #
# Demo / self-check
# --------------------------------------------------------------------------- #
if __name__ == "__main__":
    key = jax.random.PRNGKey(0)
    k1, k2, k3, k4 = jax.random.split(key, 4)

    # Config 1: batch=2, C=1 (the module requires 1 channel), 16x16 spatial,
    # tile_h=8 so the halo / multi-row-tile path is exercised.
    n, c, h, w = 2, 1, 16, 16
    y_pred = jax.random.uniform(k1, (n, c, h, w), dtype=jnp.float32)
    y_true = (jax.random.uniform(k2, (n, c, h, w)) > 0.5).astype(jnp.float32)
    loss = jax.block_until_ready(edge_hold_loss(y_pred, y_true, tile_h=8))
    ref = jax.block_until_ready(_reference_loss(y_pred, y_true))
    assert abs(float(loss) - float(ref)) < 1e-4, (float(loss), float(ref))

    # Config 2: non-square spatial dims, automatic tile selection (single tile).
    n2, h2, w2 = 1, 24, 40
    y_pred2 = jax.random.uniform(k3, (n2, 1, h2, w2), dtype=jnp.float32)
    y_true2 = (jax.random.uniform(k4, (n2, 1, h2, w2)) > 0.5).astype(jnp.float32)
    loss2 = jax.block_until_ready(edge_hold_loss(y_pred2, y_true2))
    ref2 = jax.block_until_ready(_reference_loss(y_pred2, y_true2))
    assert abs(float(loss2) - float(ref2)) < 1e-4, (float(loss2), float(ref2))

    print("KERNEL_OK")
</pallas_src>

<mosaic_0001>
module attributes {stable_mosaic.version = 11 : i64} {
  func.func @_edge_hold_kernel(%arg0: i32, %arg1: i32, %arg2: memref<1x8x16xf32, #tpu.memory_space<vmem>>, %arg3: memref<1x8x16xf32, #tpu.memory_space<vmem>>, %arg4: memref<1x1x2x16xf32, #tpu.memory_space<vmem>>, %arg5: memref<1x1x2x16xf32, #tpu.memory_space<vmem>>, %arg6: memref<1x1x1x16xf32, #tpu.memory_space<vmem>>, %arg7: memref<10x18xf32, #tpu.memory_space<vmem>>, %arg8: memref<10x18xf32, #tpu.memory_space<vmem>>) attributes {dimension_semantics = [#tpu.dimension_semantics<parallel>, #tpu.dimension_semantics<parallel>], iteration_bounds = array<i64: 2, 2>, scalar_prefetch = 0 : i64, scratch_operands = 2 : i64, tpu.core_type = #tpu.core_type<tc>, window_params = [{transform_indices = @transform_0, window_bounds = array<i64: 1, 8, 16>}, {transform_indices = @transform_1, window_bounds = array<i64: 1, 8, 16>}, {transform_indices = @transform_2, window_bounds = array<i64: 1, 1, 2, 16>}, {transform_indices = @transform_3, window_bounds = array<i64: 1, 1, 2, 16>}, {transform_indices = @transform_4, window_bounds = array<i64: 1, 1, 1, 16>}]} {
    %c0 = arith.constant 0 : index
    %c0_0 = arith.constant 0 : index
    %c0_1 = arith.constant 0 : index
    %0 = vector.load %arg2[%c0, %c0_0, %c0_1] : memref<1x8x16xf32, #tpu.memory_space<vmem>>, vector<1x8x16xf32>
    %1 = vector.shape_cast %0 : vector<1x8x16xf32> to vector<8x16xf32>
    %c0_2 = arith.constant 0 : index
    %c0_3 = arith.constant 0 : index
    %c0_4 = arith.constant 0 : index
    %c0_5 = arith.constant 0 : index
    %2 = vector.load %arg4[%c0_2, %c0_3, %c0_4, %c0_5] : memref<1x1x2x16xf32, #tpu.memory_space<vmem>>, vector<1x1x2x16xf32>
    %3 = vector.shape_cast %2 : vector<1x1x2x16xf32> to vector<2x16xf32>
    %cst = arith.constant 0.000000e+00 : f32
    %4 = vector.broadcast %cst : f32 to vector<10x18xf32>
    %c0_6 = arith.constant 0 : index
    %c0_7 = arith.constant 0 : index
    %5 = vector.load %arg7[%c0_6, %c0_7] : memref<10x18xf32, #tpu.memory_space<vmem>>, vector<10x18xf32>
    tpu.vector_store %arg7[%c0_6, %c0_7], %4 {strides = array<i32>} : memref<10x18xf32, #tpu.memory_space<vmem>>, vector<10x18xf32>,
    %c1 = arith.constant 1 : index
    %c1_8 = arith.constant 1 : index
    %6 = vector.load %arg7[%c1, %c1_8] : memref<10x18xf32, #tpu.memory_space<vmem>>, vector<8x16xf32>
    tpu.vector_store %arg7[%c1, %c1_8], %1 {strides = array<i32>} : memref<10x18xf32, #tpu.memory_space<vmem>>, vector<8x16xf32>,
    %7 = vector.extract_strided_slice %3 {offsets = [0, 0], sizes = [1, 16], strides = [1, 1]} : vector<2x16xf32> to vector<1x16xf32>
    %c0_9 = arith.constant 0 : index
    %c1_10 = arith.constant 1 : index
    %8 = vector.load %arg7[%c0_9, %c1_10] : memref<10x18xf32, #tpu.memory_space<vmem>>, vector<1x16xf32>
    tpu.vector_store %arg7[%c0_9, %c1_10], %7 {strides = array<i32>} : memref<10x18xf32, #tpu.memory_space<vmem>>, vector<1x16xf32>,
    %9 = vector.extract_strided_slice %3 {offsets = [1, 0], sizes = [1, 16], strides = [1, 1]} : vector<2x16xf32> to vector<1x16xf32>
    %c9 = arith.constant 9 : index
    %c1_11 = arith.constant 1 : index
    %10 = vector.load %arg7[%c9, %c1_11] : memref<10x18xf32, #tpu.memory_space<vmem>>, vector<1x16xf32>
    tpu.vector_store %arg7[%c9, %c1_11], %9 {strides = array<i32>} : memref<10x18xf32, #tpu.memory_space<vmem>>, vector<1x16xf32>,
    %c0_12 = arith.constant 0 : index
    %c0_13 = arith.constant 0 : index
    %11 = vector.load %arg7[%c0_12, %c0_13] : memref<10x18xf32, #tpu.memory_space<vmem>>, vector<10x18xf32>
    %12 = vector.extract_strided_slice %11 {offsets = [0, 0], sizes = [10, 16], strides = [1, 1]} : vector<10x18xf32> to vector<10x16xf32>
    %13 = vector.extract_strided_slice %11 {offsets = [0, 1], sizes = [10, 16], strides = [1, 1]} : vector<10x18xf32> to vector<10x16xf32>
    %14 = arith.addf %12, %13 : vector<10x16xf32>
    %15 = vector.extract_strided_slice %11 {offsets = [0, 2], sizes = [10, 16], strides = [1, 1]} : vector<10x18xf32> to vector<10x16xf32>
    %16 = arith.addf %14, %15 : vector<10x16xf32>
    %17 = vector.extract_strided_slice %16 {offsets = [0, 0], sizes = [8, 16], strides = [1, 1]} : vector<10x16xf32> to vector<8x16xf32>
    %18 = vector.extract_strided_slice %16 {offsets = [1, 0], sizes = [8, 16], strides = [1, 1]} : vector<10x16xf32> to vector<8x16xf32>
    %19 = arith.addf %17, %18 : vector<8x16xf32>
    %20 = vector.extract_strided_slice %16 {offsets = [2, 0], sizes = [8, 16], strides = [1, 1]} : vector<10x16xf32> to vector<8x16xf32>
    %21 = arith.addf %19, %20 : vector<8x16xf32>
    %cst_14 = arith.constant 9.000000e+00 : f32
    %22 = vector.broadcast %cst_14 : f32 to vector<8x16xf32>
    %23 = arith.mulf %22, %1 : vector<8x16xf32>
    %24 = arith.subf %23, %21 : vector<8x16xf32>
    %25 = math.absf %24 : vector<8x16xf32>
    %26 = math.tanh %25 : vector<8x16xf32>
    %c0_15 = arith.constant 0 : index
    %c0_16 = arith.constant 0 : index
    %c0_17 = arith.constant 0 : index
    %27 = vector.load %arg3[%c0_15, %c0_16, %c0_17] : memref<1x8x16xf32, #tpu.memory_space<vmem>>, vector<1x8x16xf32>
    %28 = vector.shape_cast %27 : vector<1x8x16xf32> to vector<8x16xf32>
    %c0_18 = arith.constant 0 : index
    %c0_19 = arith.constant 0 : index
    %c0_20 = arith.constant 0 : index
    %c0_21 = arith.constant 0 : index
    %29 = vector.load %arg5[%c0_18, %c0_19, %c0_20, %c0_21] : memref<1x1x2x16xf32, #tpu.memory_space<vmem>>, vector<1x1x2x16xf32>
    %30 = vector.shape_cast %29 : vector<1x1x2x16xf32> to vector<2x16xf32>
    %cst_22 = arith.constant 0.000000e+00 : f32
    %31 = vector.broadcast %cst_22 : f32 to vector<10x18xf32>
    %c0_23 = arith.constant 0 : index
    %c0_24 = arith.constant 0 : index
    %32 = vector.load %arg8[%c0_23, %c0_24] : memref<10x18xf32, #tpu.memory_space<vmem>>, vector<10x18xf32>
    tpu.vector_store %arg8[%c0_23, %c0_24], %31 {strides = array<i32>} : memref<10x18xf32, #tpu.memory_space<vmem>>, vector<10x18xf32>,
    %c1_25 = arith.constant 1 : index
    %c1_26 = arith.constant 1 : index
    %33 = vector.load %arg8[%c1_25, %c1_26] : memref<10x18xf32, #tpu.memory_space<vmem>>, vector<8x16xf32>
    tpu.vector_store %arg8[%c1_25, %c1_26], %28 {strides = array<i32>} : memref<10x18xf32, #tpu.memory_space<vmem>>, vector<8x16xf32>,
    %34 = vector.extract_strided_slice %30 {offsets = [0, 0], sizes = [1, 16], strides = [1, 1]} : vector<2x16xf32> to vector<1x16xf32>
    %c0_27 = arith.constant 0 : index
    %c1_28 = arith.constant 1 : index
    %35 = vector.load %arg8[%c0_27, %c1_28] : memref<10x18xf32, #tpu.memory_space<vmem>>, vector<1x16xf32>
    tpu.vector_store %arg8[%c0_27, %c1_28], %34 {strides = array<i32>} : memref<10x18xf32, #tpu.memory_space<vmem>>, vector<1x16xf32>,
    %36 = vector.extract_strided_slice %30 {offsets = [1, 0], sizes = [1, 16], strides = [1, 1]} : vector<2x16xf32> to vector<1x16xf32>
    %c9_29 = arith.constant 9 : index
    %c1_30 = arith.constant 1 : index
    %37 = vector.load %arg8[%c9_29, %c1_30] : memref<10x18xf32, #tpu.memory_space<vmem>>, vector<1x16xf32>
    tpu.vector_store %arg8[%c9_29, %c1_30], %36 {strides = array<i32>} : memref<10x18xf32, #tpu.memory_space<vmem>>, vector<1x16xf32>,
    %c0_31 = arith.constant 0 : index
    %c0_32 = arith.constant 0 : index
    %38 = vector.load %arg8[%c0_31, %c0_32] : memref<10x18xf32, #tpu.memory_space<vmem>>, vector<10x18xf32>
    %39 = vector.extract_strided_slice %38 {offsets = [0, 0], sizes = [10, 16], strides = [1, 1]} : vector<10x18xf32> to vector<10x16xf32>
    %40 = vector.extract_strided_slice %38 {offsets = [0, 1], sizes = [10, 16], strides = [1, 1]} : vector<10x18xf32> to vector<10x16xf32>
    %41 = arith.addf %39, %40 : vector<10x16xf32>
    %42 = vector.extract_strided_slice %38 {offsets = [0, 2], sizes = [10, 16], strides = [1, 1]} : vector<10x18xf32> to vector<10x16xf32>
    %43 = arith.addf %41, %42 : vector<10x16xf32>
    %44 = vector.extract_strided_slice %43 {offsets = [0, 0], sizes = [8, 16], strides = [1, 1]} : vector<10x16xf32> to vector<8x16xf32>
    %45 = vector.extract_strided_slice %43 {offsets = [1, 0], sizes = [8, 16], strides = [1, 1]} : vector<10x16xf32> to vector<8x16xf32>
    %46 = arith.addf %44, %45 : vector<8x16xf32>
    %47 = vector.extract_strided_slice %43 {offsets = [2, 0], sizes = [8, 16], strides = [1, 1]} : vector<10x16xf32> to vector<8x16xf32>
    %48 = arith.addf %46, %47 : vector<8x16xf32>
    %cst_33 = arith.constant 9.000000e+00 : f32
    %49 = vector.broadcast %cst_33 : f32 to vector<8x16xf32>
    %50 = arith.mulf %49, %28 : vector<8x16xf32>
    %51 = arith.subf %50, %48 : vector<8x16xf32>
    %52 = math.absf %51 : vector<8x16xf32>
    %53 = math.tanh %52 : vector<8x16xf32>
    %54 = math.exp %53 : vector<8x16xf32>
    %cst_34 = arith.constant 1.000000e+00 : f32
    %55 = vector.broadcast %cst_34 : f32 to vector<8x16xf32>
    %56 = arith.addf %55, %54 : vector<8x16xf32>
    %57 = math.log %56 : vector<8x16xf32>
    %58 = arith.mulf %26, %53 : vector<8x16xf32>
    %59 = arith.subf %57, %58 : vector<8x16xf32>
    %cst_35 = arith.constant dense<0.000000e+00> : vector<16xf32>
    %60 = vector.multi_reduction <add>, %59, %cst_35 [0] : vector<8x16xf32> to vector<16xf32>
    %61 = vector.shape_cast %60 : vector<16xf32> to vector<1x16xf32>
    %c0_36 = arith.constant 0 : index
    %c0_37 = arith.constant 0 : index
    %c0_38 = arith.constant 0 : index
    %c0_39 = arith.constant 0 : index
    %62 = vector.load %arg6[%c0_36, %c0_37, %c0_38, %c0_39] : memref<1x1x1x16xf32, #tpu.memory_space<vmem>>, vector<1x1x1x16xf32>
    %63 = vector.shape_cast %62 : vector<1x1x1x16xf32> to vector<1x16xf32>
    %64 = vector.shape_cast %61 : vector<1x16xf32> to vector<1x1x1x16xf32>
    tpu.vector_store %arg6[%c0_36, %c0_37, %c0_38, %c0_39], %64 {strides = array<i32>} : memref<1x1x1x16xf32, #tpu.memory_space<vmem>>, vector<1x1x1x16xf32>,
    return
  }
  func.func @transform_0(%arg0: i32, %arg1: i32) -> (i32, i32, i32) {
    %c0_i32 = arith.constant 0 : i32
    %c0_i32_0 = arith.constant 0 : i32
    return %arg0, %arg1, %c0_i32 : i32, i32, i32
  }
  func.func @transform_1(%arg0: i32, %arg1: i32) -> (i32, i32, i32) {
    %c0_i32 = arith.constant 0 : i32
    %c0_i32_0 = arith.constant 0 : i32
    return %arg0, %arg1, %c0_i32 : i32, i32, i32
  }
  func.func @transform_2(%arg0: i32, %arg1: i32) -> (i32, i32, i32, i32) {
    %c0_i32 = arith.constant 0 : i32
    %c0_i32_0 = arith.constant 0 : i32
    %c0_i32_1 = arith.constant 0 : i32
    return %arg0, %arg1, %c0_i32, %c0_i32_0 : i32, i32, i32, i32
  }
  func.func @transform_3(%arg0: i32, %arg1: i32) -> (i32, i32, i32, i32) {
    %c0_i32 = arith.constant 0 : i32
    %c0_i32_0 = arith.constant 0 : i32
    %c0_i32_1 = arith.constant 0 : i32
    return %arg0, %arg1, %c0_i32, %c0_i32_0 : i32, i32, i32, i32
  }
  func.func @transform_4(%arg0: i32, %arg1: i32) -> (i32, i32, i32, i32) {
    %c0_i32 = arith.constant 0 : i32
    %c0_i32_0 = arith.constant 0 : i32
    %c0_i32_1 = arith.constant 0 : i32
    return %arg0, %arg1, %c0_i32, %c0_i32_0 : i32, i32, i32, i32
  }
}

</mosaic_0001>

<bundles_post_ra>
// kernel: edge_hold_loss.1
= control target key start
LH: loop header
LB: loop body
LE: loop exit
PB: predicated region body
PF: predicated region fallthrough
CT: control target
= control target key end

     0   :  { %s717_s15 = smov 0   ;;  %s719_s16 = smov 0   ;;  %s790_s0 = inlined_call_operand.vmem [shape: f32[2,16,16], index: 0, kind: input, shape index: {}]   ;;  %s791_s1 = inlined_call_operand.vmem [shape: f32[2,16,16], index: 1, kind: input, shape index: {}]   ;;  %s792_s2 = inlined_call_operand.vmem [shape: f32[2,2,2,16], index: 2, kind: input, shape index: {}]   ;;  %s793_s3 = inlined_call_operand.vmem [shape: f32[2,2,2,16], index: 3, kind: input, shape index: {}]   ;;  %s794_s4 = inlined_call_operand.vmem [shape: f32[2,2,1,16], index: 4, kind: output, shape index: {}]  }
   0x1   :  { %s721_s17 = smov 0   ;;  %s723_s18 = smov 0  }
   0x2   :  { %s725_s19 = smov 0  }
   0x3 LB: > { %s23_s20 = sadd.s32 1, %s678_s17  ;;  %s26_s21 = sadd.s32 1, %s682_s18  ;;  %s686_s19 = sphi %s725_s19, %s14_s19   ;;  %s682_s18 = sphi %s723_s18, %s798_s18   ;;  %s678_s17 = sphi %s721_s17, %s797_s17   ;;  %s674_s16 = sphi %s719_s16, %s796_s16   ;;  %s670_s15 = sphi %s717_s15, %s795_s15  }
   0x4   : > { %p24_p0 = scmp.ge.s32.totalorder %s23_s20, 2  ;;  %p584_p1 = scmp.ge.s32.totalorder %s686_s19, 1 }
   0x5   : > { %p226_p2 = scmp.lt.s32.totalorder %s686_s19, 5 }
   0x6   : > { %s800_s20 = smov (%p24_p0, %s23_s20), 0  ;;  %s802_s21 = smov (!%p24_p0, %s26_s21), %s682_s18 }
   0x7   : > { %p227_p3 = pnand %p584_p1, %p226_p2  ;;  %p28_p4 = scmp.ge.s32.totalorder %s802_s21, 2 }
   0x8   : > { %p281_p5 = scmp.lt.s32.totalorder (!%p227_p3), %s674_s16, 1  ;;  %p283_p6 = scmp.lt.s32.totalorder (!%p227_p3), %s670_s15, 1  ;;  %vm322_vm0 = vcmask (!%p227_p3), 146432   ;;  %vm324_vm1 = vcmask (!%p227_p3), 140288   ;;  %v688_v0 = vmov (!%p227_p3), 0.0   ;;  %vm330_vm2 = vcmask (!%p227_p3), 138248  }
   0x9   : > { %s804_s21 = smov (%p28_p4, %s802_s21), 0  ;;  %230 = sbr.rel (%p227_p3) target bundleno = 337 (0x151), region = 36 }
   0xa   : > { %380 = vst.msk [vmem:[#allocation3] sm:$0xff] (!%p227_p3), %vm322_vm0, %v688_v0  ;;  %323 = vst.msk [vmem:[#allocation2] sm:$0xff] (!%p227_p3), %vm322_vm0, %v688_v0  ;;  %s689_s9 = smov (!%p227_p3), 1   ;;  %vm336_vm3 = vcmask (!%p227_p3), 131080   ;;  %vm338_vm4 = vcmask (!%p227_p3), 132105   ;;  %s690_s13 = smov (!%p227_p3), 127  }
   0xb   : > { %381 = vst.msk [vmem:[#allocation3 + $0x8] sm:$0x3] (!%p227_p3), %vm324_vm1, %v688_v0  ;;  %325 = vst.msk [vmem:[#allocation2 + $0x8] sm:$0x3] (!%p227_p3), %vm324_vm1, %v688_v0  ;;  %s691_s14 = smov (!%p227_p3), 126   ;;  %vm362_vm5 = vcmask (!%p227_p3), 1046528  }
   0xc   : > { %vm368_vm6 = vcmask (!%p227_p3), 1045504   ;;  %vm436_vm7 = vcmask (!%p227_p3), 130048   ;;  %vm444_vm8 = vcmask (!%p227_p3), 122880  }
  0x10   : > { %s806_s16 = smov (!%p281_p5, %s674_s16), 1  ;;  %s808_s15 = smov (!%p283_p6, %s670_s15), 1 }
  0x11   : > { %s585_s22 = sshll.u32 %s806_s16, 1 }
  0x12   : > { %s747_s23 = sadd.s32 %s585_s22, %s808_s15 }
  0x13   : > { %s586_s24 = sshll.u32 %s747_s23, 3  ;;  %s590_s28 = sshll.u32 %s747_s23, 1 }
  0x14   : > { %s296_s27 = scalar_lea.vmem %s791_s1, %s586_s24  ;;  %s312_s5 = scalar_lea.vmem %s793_s3, %s590_s28 }
  0x15   : > { %v378_v1 = vld [vmem:[%s296_s27] sm:$0xff]  ;;  %s288_s8 = scalar_lea.vmem %s790_s0, %s586_s24  ;;  %s304_s12 = scalar_lea.vmem %s792_s2, %s590_s28 }
  0x16   : > { %383 = vrot.lane.b32.xlu0 %v378_v1, %s689_s9  ;;  %v760_v2 = vld [vmem:[%s288_s8] sm:$0xff]  ;;  %v425_v28 = vmul.f32 9.0, %v378_v1  ;;  %s319_s22 = scalar_lea.vmem %s794_s4, %s747_s23 }
  0x17   : > { %v379_v3 = vld [vmem:[%s312_s5] sm:$0x3]  ;;  %327 = vrot.lane.b32.xlu1 %v760_v2, %s689_s9  ;;  %v374_v45 = vmul.f32 9.0, %v760_v2 }
  0x18   : > { %v321_v4 = vld [vmem:[%s304_s12] sm:$0x3] }
  0x1a   : > { %388 = vrot.lane.b32.xlu0 %v379_v3, %s689_s9 }
  0x1b   : > { %333 = vrot.lane.b32.xlu1 %v321_v4, %s689_s9 }
  0x88   : > { %v384_v5 = vpop.permute.xlu0 %383 }
  0x89   : > { %386 = vst.msk [vmem:[#allocation3 + $0x1] sm:$0xff] %vm330_vm2, %v384_v5  ;;  %v328_v6 = vpop.permute.xlu1 %327 }
  0x8a   : > { %331 = vst.msk [vmem:[#allocation2 + $0x1] sm:$0xff] %vm330_vm2, %v328_v6 }
  0x8c   : > { %v389_v7 = vpop.permute.xlu0 %388 }
  0x8d   : > { %391 = vst.msk [vmem:[#allocation3] sm:$0x1] %vm336_vm3, %v389_v7  ;;  %v334_v8 = vpop.permute.xlu1 %333 }
  0x8e   : > { %392 = vst.msk [vmem:[#allocation3 + $0x8] sm:$0x2] %vm338_vm4, %v389_v7  ;;  %339 = vst.msk [vmem:[#allocation2 + $0x8] sm:$0x2] %vm338_vm4, %v334_v8 }
  0x8f   : > { %337 = vst.msk [vmem:[#allocation2] sm:$0x1] %vm336_vm3, %v334_v8 }
  0x94   : > { %v393_v9 = vld [vmem:[#allocation3] sm:$0xff] }
  0x95   : > { %v394_v10 = vld [vmem:[#allocation3 + $0x8] sm:$0x3]  ;;  %397 = vrot.lane.b32.xlu0 %v393_v9, %s690_s13  ;;  %v341_v11 = vld [vmem:[#allocation2 + $0x8] sm:$0x3] }
  0x96   : > { %399 = vrot.lane.b32.xlu1 %v394_v10, %s690_s13  ;;  %v340_v12 = vld [vmem:[#allocation2] sm:$0xff] }
  0x99   : > { %405 = vrot.lane.b32.xlu0 %v393_v9, %s691_s14 }
  0x9a   : > { %407 = vrot.lane.b32.xlu1 %v394_v10, %s691_s14 }
  0x9d   : > { %344 = vrot.lane.b32.xlu0 %v340_v12, %s690_s13 }
  0x9e   : > { %346 = vrot.lane.b32.xlu1 %v341_v11, %s690_s13 }
  0xa1   : > { %352 = vrot.lane.b32.xlu0 %v340_v12, %s691_s14 }
  0xa2   : > { %354 = vrot.lane.b32.xlu1 %v341_v11, %s691_s14 }
 0x107   : > { %v398_v13 = vpop.permute.xlu0 %397 }
 0x108   : > { %v400_v14 = vpop.permute.xlu1 %399  ;;  %v403_v15 = vadd.f32 %v398_v13, %v393_v9 }
 0x109   : > { %v404_v16 = vadd.f32 %v400_v14, %v394_v10 }
 0x10b   : > { %v406_v17 = vpop.permute.xlu0 %405 }
 0x10c   : > { %v408_v18 = vpop.permute.xlu1 %407  ;;  %v411_v19 = vadd.f32 %v406_v17, %v403_v15 }
 0x10d   : > { %v412_v20 = vadd.f32 %v408_v18, %v404_v16 }
 0x10e   : > { %v415_v21 = vrot.slane %v411_v19, 1  ;;  %v420_v22 = vrot.slane %v411_v19, 2 }
 0x10f   : > { %v416_v23 = vrot.slane %v412_v20, 1  ;;  %v421_v24 = vrot.slane %v412_v20, 2  ;;  %v345_v25 = vpop.permute.xlu0 %344 }
 0x110   : > { %v347_v26 = vpop.permute.xlu1 %346  ;;  %v350_v31 = vadd.f32 %v345_v25, %v340_v12 }
 0x111   : > { %v417_v27 = vsel %vm362_vm5, %v415_v21, %v416_v23  ;;  %v422_v30 = vsel %vm368_vm6, %v420_v22, %v421_v24  ;;  %v351_v32 = vadd.f32 %v347_v26, %v341_v11 }
 0x112   : > { %v419_v29 = vadd.f32 %v417_v27, %v411_v19 }
 0x113   : > { %v353_v34 = vpop.permute.xlu0 %352 }
 0x114   : > { %v424_v33 = vadd.f32 %v422_v30, %v419_v29  ;;  %v355_v35 = vpop.permute.xlu1 %354  ;;  %v358_v36 = vadd.f32 %v353_v34, %v350_v31 }
 0x115   : > { %v359_v37 = vadd.f32 %v355_v35, %v351_v32 }
 0x116   : > { %v426_v38 = vsub.f32 %v425_v28, %v424_v33  ;;  %v363_v39 = vrot.slane %v358_v36, 1  ;;  %v369_v40 = vrot.slane %v358_v36, 2 }
 0x117   : > { %v364_v41 = vrot.slane %v359_v37, 1  ;;  %v370_v42 = vrot.slane %v359_v37, 2 }
 0x118   : > { %v427_v43 = vand.u32 2147483647, %v426_v38 }
 0x119   : > { %v365_v44 = vsel %vm362_vm5, %v363_v39, %v364_v41  ;;  %v371_v47 = vsel %vm368_vm6, %v369_v40, %v370_v42 }
 0x11a   : > { %640 = vtanh.f32 %v427_v43  ;;  %v367_v46 = vadd.f32 %v365_v44, %v358_v36 }
 0x11c   : > { %v373_v48 = vadd.f32 %v371_v47, %v367_v46 }
 0x11e   : > { %v375_v49 = vsub.f32 %v374_v45, %v373_v48 }
 0x120   : > { %v376_v50 = vand.u32 2147483647, %v375_v49 }
 0x122   : > { %642 = vtanh.f32 %v376_v50 }
 0x124   : > { %v641_v51 = vpop.eup %640 }
 0x125   : > { %v429_v52 = vmul.f32 1.442695, %v641_v51 }
 0x127   : > { %644 = vpow2.f32 %v429_v52 }
 0x12c   : > { %v643_v53 = vpop.eup %642 }
 0x12d   : > { %v434_v54 = vmul.f32 %v643_v53, %v641_v51 }
 0x131   : > { %v645_v55 = vpop.eup %644 }
 0x132   : > { %v431_v56 = vadd.f32 1.0, %v645_v55 }
 0x134   : > { %646 = vlog2.f32 %v431_v56 }
 0x13e   : > { %v647_v57 = vpop.eup %646 }
 0x13f   : > { %v433_v58 = vmul.f32 0.6931472, %v647_v57 }
 0x141   : > { %v435_v59 = vsub.f32 %v433_v58, %v434_v54 }
 0x143   : > { %v437_v60 = vsel %vm436_vm7, %v435_v59, 0.0 }
 0x144   : > { %v438_v61 = vrot.slane %v437_v60, 4 }
 0x146   : > { %v439_v62 = vadd.f32 %v438_v61, %v437_v60 }
 0x148   : > { %v440_v63 = vrot.slane %v439_v62, 2 }
 0x14a   : > { %v441_v0 = vadd.f32 %v440_v63, %v439_v62 }
 0x14c   : > { %v442_v1 = vrot.slane %v441_v0, 1 }
 0x14e   : > { %v443_v2 = vadd.f32 %v442_v1, %v441_v0 }
 0x150   : > { %445 = vst.msk [vmem:[%s319_s22] sm:$0x1] %vm444_vm8, %v443_v2 }
 0x151 PF: > { %s14_s19 = sadd.s32 1, %s686_s19   ;;  %s795_s15 = smov %s678_s17 }
 0x152   : > { %p11_p7 = scmp.ge.s32.totalorder %s14_s19, 6   ;;  %s796_s16 = smov %s682_s18 }
 0x153   : > { %s797_s17 = smov %s800_s20  ;;  %s798_s18 = smov %s804_s21 }
 0x154   :  { %13 = sbr.rel (!%p11_p7) target bundleno = 3 (0x3), region = 75 }

</bundles_post_ra>
